<compile_context>
chip_gen: v7x
topology: tpu7x:2x2x1
jax: 0.10.0
libtpu: 0.0.40
codegen_flags: <defaults>
</compile_context>

<pallas_src>
import jax
import jax.numpy as jnp
from jax.experimental import pallas as pl
from jax.experimental.pallas import tpu as pltpu


def rmsnorm_kernel(x_ref, g_ref, o_ref):
    # (block_m, dim) tile; reduction + epilogue in f32.
    x = x_ref[...].astype(jnp.float32)
    ms = jnp.mean(x * x, axis=-1, keepdims=True)      # (block_m, 1)
    inv_rms = jax.lax.rsqrt(ms)                       # EUP transcendental
    g = g_ref[...].astype(jnp.float32)                # (1, dim) row-broadcast
    o_ref[...] = (x * inv_rms * g).astype(o_ref.dtype)


def _round_up(a: int, b: int) -> int:
    return ((a + b - 1) // b) * b


def _pick_block_m(m: int, dim: int, itemsize: int) -> int:
    """Largest sublane-aligned row tile whose per-step working set fits ~8 MiB."""
    budget = 8 * 1024 * 1024
    # double-buffered input + output blocks (itemsize each) + f32 intermediates.
    per_row = dim * (2 * 2 * itemsize + 4)
    bm = budget // max(per_row, 1)
    bm = max(8, min(1024, bm))
    bm = (bm // 8) * 8                      # sublane-aligned
    bm = min(bm, _round_up(m, 8))           # never bigger than (rounded) row count
    return max(bm, 8)


def rms_norm(x, gamma):
    """RMSNorm over the last dim.  x: [..., dim]; gamma: [dim]."""
    dim = x.shape[-1]
    lead = x.shape[:-1]
    x2d = x.reshape(-1, dim)
    m = x2d.shape[0]

    itemsize = jnp.dtype(x.dtype).itemsize
    block_m = _pick_block_m(m, dim, itemsize)
    padded_m = _round_up(m, block_m)
    if padded_m != m:
        # Pad with ones so padded rows don't produce 0/0 NaNs; sliced off below.
        pad = jnp.ones((padded_m - m, dim), x2d.dtype)
        x2d = jnp.concatenate([x2d, pad], axis=0)

    g2d = gamma.reshape(1, dim)

    cost = pl.CostEstimate(
        flops=4 * padded_m * dim,                          # square, reduce, 2 muls
        transcendentals=padded_m,                          # one rsqrt per row
        bytes_accessed=2 * padded_m * dim * itemsize
        + dim * jnp.dtype(gamma.dtype).itemsize,
    )

    out = pl.pallas_call(
        rmsnorm_kernel,
        out_shape=jax.ShapeDtypeStruct((padded_m, dim), x.dtype),
        grid_spec=pltpu.PrefetchScalarGridSpec(
            num_scalar_prefetch=0,
            grid=(padded_m // block_m,),
            in_specs=[
                pl.BlockSpec((block_m, dim), lambda i: (i, 0)),  # x row tile
                pl.BlockSpec((1, dim), lambda i: (0, 0)),        # gamma (resident)
            ],
            out_specs=pl.BlockSpec((block_m, dim), lambda i: (i, 0)),
        ),
        compiler_params=pltpu.CompilerParams(
            dimension_semantics=("parallel",),
        ),
        cost_estimate=cost,
    )(x2d, g2d)

    if padded_m != m:
        out = out[:m]
    return out.reshape(*lead, dim)


def reference(x, gamma):
    xf = x.astype(jnp.float32)
    rms = jnp.sqrt(jnp.mean(xf * xf, axis=-1, keepdims=True))
    return (gamma.astype(jnp.float32) * (xf / rms)).astype(x.dtype)


if __name__ == "__main__":
    # Small shapes consistent with the module: batch=2, seq=8, dim=32.
    B, S, DIM = 2, 8, 32
    key = jax.random.PRNGKey(0)
    kx, kg = jax.random.split(key, 2)

    x = jax.random.normal(kx, (B, S, DIM), dtype=jnp.float32)
    # PyTorch init is ones; perturb slightly so the gamma scaling path is tested.
    gamma = 1.0 + 0.1 * jax.random.normal(kg, (DIM,), dtype=jnp.float32)

    y = rms_norm(x, gamma)
    jax.block_until_ready(y)

    y_ref = reference(x, gamma)
    assert y.shape == x.shape
    assert jnp.allclose(y, y_ref, atol=1e-5, rtol=1e-5), "mismatch vs reference"

    print("KERNEL_OK")
</pallas_src>

<mosaic_0001>
module attributes {stable_mosaic.version = 11 : i64} {
  func.func @rmsnorm_kernel(%arg0: i32, %arg1: memref<16x32xf32, #tpu.memory_space<vmem>>, %arg2: memref<1x32xf32, #tpu.memory_space<vmem>>, %arg3: memref<16x32xf32, #tpu.memory_space<vmem>>) attributes {dimension_semantics = [#tpu.dimension_semantics<parallel>], iteration_bounds = array<i64: 1>, scalar_prefetch = 0 : i64, scratch_operands = 0 : i64, tpu.core_type = #tpu.core_type<tc>, window_params = [{transform_indices = @transform_0, window_bounds = array<i64: 16, 32>}, {pipeline_mode = #tpu.pipeline_mode<synchronous>, transform_indices = @transform_1, window_bounds = array<i64: 1, 32>}, {transform_indices = @transform_2, window_bounds = array<i64: 16, 32>}]} {
    %c0 = arith.constant 0 : index
    %c0_0 = arith.constant 0 : index
    %0 = vector.load %arg1[%c0, %c0_0] : memref<16x32xf32, #tpu.memory_space<vmem>>, vector<16x32xf32>
    %1 = arith.mulf %0, %0 : vector<16x32xf32>
    %cst = arith.constant dense<0.000000e+00> : vector<16xf32>
    %2 = vector.multi_reduction <add>, %1, %cst [1] : vector<16x32xf32> to vector<16xf32>
    %3 = vector.shape_cast %2 : vector<16xf32> to vector<16x1xf32>
    %cst_1 = arith.constant 3.200000e+01 : f32
    %4 = vector.broadcast %cst_1 : f32 to vector<16x1xf32>
    %5 = arith.divf %3, %4 : vector<16x1xf32>
    %6 = math.rsqrt %5 : vector<16x1xf32>
    %c0_2 = arith.constant 0 : index
    %c0_3 = arith.constant 0 : index
    %7 = vector.load %arg2[%c0_2, %c0_3] : memref<1x32xf32, #tpu.memory_space<vmem>>, vector<1x32xf32>
    %8 = vector.broadcast %6 : vector<16x1xf32> to vector<16x32xf32>
    %9 = arith.mulf %0, %8 : vector<16x32xf32>
    %10 = vector.broadcast %7 : vector<1x32xf32> to vector<16x32xf32>
    %11 = arith.mulf %9, %10 : vector<16x32xf32>
    %c0_4 = arith.constant 0 : index
    %c0_5 = arith.constant 0 : index
    %12 = vector.load %arg3[%c0_4, %c0_5] : memref<16x32xf32, #tpu.memory_space<vmem>>, vector<16x32xf32>
    tpu.vector_store %arg3[%c0_4, %c0_5], %11 {strides = array<i32>} : memref<16x32xf32, #tpu.memory_space<vmem>>, vector<16x32xf32>,
    return
  }
  func.func @transform_0(%arg0: i32) -> (i32, i32) {
    %c0_i32 = arith.constant 0 : i32
    %c0_i32_0 = arith.constant 0 : i32
    return %arg0, %c0_i32 : i32, i32
  }
  func.func @transform_1(%arg0: i32) -> (i32, i32) {
    %c0_i32 = arith.constant 0 : i32
    %c0_i32_0 = arith.constant 0 : i32
    %c0_i32_1 = arith.constant 0 : i32
    return %c0_i32, %c0_i32_0 : i32, i32
  }
  func.func @transform_2(%arg0: i32) -> (i32, i32) {
    %c0_i32 = arith.constant 0 : i32
    %c0_i32_0 = arith.constant 0 : i32
    return %arg0, %c0_i32 : i32, i32
  }
}

</mosaic_0001>

<bundles_post_ra>
// kernel: tpu_custom_call.1
= control target key start
LH: loop header
LB: loop body
LE: loop exit
PB: predicated region body
PF: predicated region fallthrough
CT: control target
= control target key end

     0   :  { %7 = vsyncpa [#allocation3], 0  ;;  %s185_s0 = inlined_call_operand.hbm [shape: f32[16,32], index: 0, kind: input, shape index: {}]   ;;  %s186_s1 = inlined_call_operand.vmem [shape: f32[1,32], index: 1, kind: input, shape index: {}]   ;;  %s187_s2 = inlined_call_operand.hbm [shape: f32[16,32], index: 2, kind: output, shape index: {}]  }
   0x1   :  { %8 = vsyncpa [#allocation4], 0  ;;  %s129_s9 = smov [#allocation2]   ;;  %s81_s13 = scalar_lea.hbm %s185_s0, 256 }
   0x2   :  { %s14_s10 = sshll.u32 %s129_s9, 4  ;;  %p82_p0 = scmp.ne.s32.totalorder %s185_s0, %s81_s13  ;;  %s15_s10 = int_to_ptr.vmem [resolvable:$true] %s14_s10 }
   0x3   :  { %p85_p1 = scmp.lt.u32.totalorder %s81_s13, %s185_s0 }
   0x5   :  { %p87_p2 = pnand %p85_p1, %p82_p0 }
   0x7   :  { %90 = shalt.err (!%p87_p2)
}
   0x8   :  { %s91_s18 = scalar_lea.vmem %s15_s10, 256  ;;  %p96_p4 = scmp.lt.s32.totalorder %s15_s10, %s15_s10 }
   0x9   :  { %p92_p3 = scmp.ne.s32.totalorder %s15_s10, %s91_s18  ;;  %p97_p5 = scmp.lt.s32.totalorder %s91_s18, %s91_s18 }
   0xb   :  { %p98_p6 = por %p97_p5, %p96_p4 }
   0xd   :  { %p99_p7 = pnand %p98_p6, %p92_p3 }
   0xf   :  { %102 = shalt.err (!%p99_p7)
}
  0x10   :  { %s130_s19 = smov 128   ;;  %s131_s20 = smov 8  }
  0x11   :  { %20 = dma.hbm_to_vmem [thread:$0]  %s185_s0, 256, %s15_s10, [#allocation3], %s130_s19, %s130_s19, %s131_s20  }
  0x12   :  { %125 = dma.done.wait [#allocation3], 256  }
  0x13   :  { %126 = vsyncadd [#allocation3], 4294967040  ;;  %v26_v0 = vld [vmem:[#allocation2] sm:$0xff]  ;;  %vm30_vm0 = vcmask 261120   ;;  %v27_v1 = vld [vmem:[#allocation2 + $0x8] sm:$0xff]  ;;  %s132_s24 = smov [#allocation5]  }
  0x14   :  { %v28_v2 = vmul.f32 %v26_v0, %v26_v0  ;;  %v29_v3 = vmul.f32 %v27_v1, %v27_v1  ;;  %v72_v11 = vld [vmem:[%s186_s1] ss:$0 sm:$0xff]  ;;  %s60_s25 = sshll.u32 %s132_s24, 4  ;;  %s61_s25 = int_to_ptr.vmem [resolvable:$true] %s60_s25 }
  0x15   :  { %s103_s26 = scalar_lea.vmem %s61_s25, 256  ;;  %p108_p9 = scmp.lt.s32.totalorder %s61_s25, %s61_s25 }
  0x16   :  { %v31_v4 = vsel %vm30_vm0, %v28_v2, 0.0  ;;  %v34_v5 = vsel %vm30_vm0, %v29_v3, 0.0  ;;  %p104_p8 = scmp.ne.s32.totalorder %s61_s25, %s103_s26  ;;  %p109_p10 = scmp.lt.s32.totalorder %s103_s26, %s103_s26 }
  0x17   :  { %32 = vadd.xlane.f32.xlu0 %v31_v4 }
  0x18   :  { %p110_p11 = por %p109_p10, %p108_p9 }
  0x1a   :  { %p111_p12 = pnand %p110_p11, %p104_p8 }
  0x1b   :  { %35 = vadd.xlane.f32.xlu0 %v34_v5 }
  0xa4   :  { %v33_v6 = vpop.xlane.xlu0 %32 }
  0xa5   :  { %v38_v7 = vmul.f32 0.03125, %v33_v6 }
  0xa7   :  { %77 = vrsqrt.f32 %v38_v7 }
  0xa8   :  { %v36_v8 = vpop.xlane.xlu0 %35 }
  0xa9   :  { %v39_v9 = vmul.f32 0.03125, %v36_v8 }
  0xab   :  { %79 = vrsqrt.f32 %v39_v9 }
  0xb1   :  { %v78_v10 = vpop.eup %77 }
  0xb2   :  { %v43_v12 = vmul.f32 %v78_v10, %v26_v0 }
  0xb4   :  { %v51_v13 = vmul.f32 %v72_v11, %v43_v12 }
  0xb5   :  { %v80_v14 = vpop.eup %79 }
  0xb6   :  { %v44_v15 = vmul.f32 %v80_v14, %v27_v1  ;;  %53 = vst.msk [vmem:[#allocation5] sm:$0xff] %vm30_vm0, %v51_v13 }
  0xb8   :  { %v52_v16 = vmul.f32 %v72_v11, %v44_v15 }
  0xba   :  { %54 = vst.msk [vmem:[#allocation5 + $0x8] sm:$0xff] %vm30_vm0, %v52_v16 }
  0xbb   :  { %114 = shalt.err (!%p111_p12)
}
  0xbc   :  { %s115_s28 = scalar_lea.hbm %s187_s2, 256 }
  0xbd   :  { %p116_p13 = scmp.ne.s32.totalorder %s187_s2, %s115_s28  ;;  %p119_p0 = scmp.lt.u32.totalorder %s115_s28, %s187_s2 }
  0xbf   :  { %p121_p1 = pnand %p119_p0, %p116_p13 }
  0xc1   :  { %124 = shalt.err (!%p121_p1)
}
  0xc2   :  { %66 = dma.vmem_to_hbm [thread:$0]  %s61_s25, 256, %s187_s2, [#allocation4], %s130_s19, %s130_s19, %s131_s20  }
  0xc3   :  { %127 = dma.done.wait [#allocation4], 256  }
  0xc4   :  { %128 = vsyncadd [#allocation4], 4294967040 }
  0xc5   :  { %70 = vsyncpa [#allocation3], 1 }
  0xc6   :  { %71 = vsyncpa [#allocation4], 1 }

</bundles_post_ra>
